<compile_context>
chip_gen: v6e
topology: v6e:2x2x1
jax: 0.10.0
libtpu: 0.0.40
codegen_flags: <defaults>
</compile_context>

<pallas_src>
import functools

import jax
import jax.numpy as jnp
from jax.experimental import pallas as pl
from jax.experimental.pallas import tpu as pltpu


def _round_up(x: int, m: int) -> int:
    return (x + m - 1) // m * m


def _cdiv(a: int, b: int) -> int:
    return -(-a // b)


# -----------------------------------------------------------------------------
# Kernel
# -----------------------------------------------------------------------------
def agru_kernel(x_ref, h_ref, att_ref,
                wx_ref, whrz_ref, whn_ref, b_ref,
                o_ref, *, hidden_size, h_pad, matmul_dtype):
    x = x_ref[...]                       # (tb, I)  f32
    h = h_ref[...]                       # (tb, H)  f32
    att = att_ref[...]                   # (tb, 1)  f32

    # Pad h to the lane-dense gate width once, in VMEM (no HBM cost).
    if h_pad == hidden_size:
        hp = h
    else:
        hp = jnp.concatenate(
            [h, jnp.zeros((h.shape[0], h_pad - hidden_size), h.dtype)], axis=1)

    xm = x.astype(matmul_dtype)
    hm = h.astype(matmul_dtype)

    # Fused x-projection for all three gates + all three biases: (tb, 3*h_pad)
    gates_x = jnp.dot(xm, wx_ref[...],
                      preferred_element_type=jnp.float32) + b_ref[...]
    # Fused h-projection for r and z: (tb, 2*h_pad)
    rz_h = jnp.dot(hm, whrz_ref[...], preferred_element_type=jnp.float32)

    rz = jax.nn.sigmoid(gates_x[:, :2 * h_pad] + rz_h)
    r = rz[:, :h_pad]                                            # (tb, h_pad)
    # Hoisted single (tb, 1) -> (tb, h_pad) attention broadcast.
    z = rz[:, h_pad:] * jnp.broadcast_to(att, (att.shape[0], h_pad))

    # Candidate gate: n = tanh(x @ Wnx + (r*h) @ Wnh + bn)
    rh = (r * hp).astype(matmul_dtype)
    n = jnp.tanh(gates_x[:, 2 * h_pad:]
                 + jnp.dot(rh, whn_ref[...], preferred_element_type=jnp.float32))

    # output = (1 - z) * h + z * n  ==  h + z * (n - h)
    o = hp + z * (n - hp)
    if h_pad != hidden_size:
        o = o[:, :hidden_size]
    o_ref[...] = o.astype(o_ref.dtype)


# -----------------------------------------------------------------------------
# Parameter packing (fuse + pad the weight N dims only; weights are resident)
# -----------------------------------------------------------------------------
def pack_params(params, input_size, hidden_size, h_pad, matmul_dtype):
    I, H = input_size, hidden_size

    wx = jnp.zeros((I, 3 * h_pad), jnp.float32)
    wx = wx.at[:, 0:H].set(params["wrx"])
    wx = wx.at[:, h_pad:h_pad + H].set(params["wzx"])
    wx = wx.at[:, 2 * h_pad:2 * h_pad + H].set(params["wnx"])

    whrz = jnp.zeros((H, 2 * h_pad), jnp.float32)
    whrz = whrz.at[:, 0:H].set(params["wrh"])
    whrz = whrz.at[:, h_pad:h_pad + H].set(params["wzh"])

    whn = jnp.zeros((h_pad, h_pad), jnp.float32)
    whn = whn.at[:H, :H].set(params["wnh"])

    b = jnp.zeros((1, 3 * h_pad), jnp.float32)
    b = b.at[:, 0:H].set(params["br"])
    b = b.at[:, h_pad:h_pad + H].set(params["bz"])
    b = b.at[:, 2 * h_pad:2 * h_pad + H].set(params["bn"])

    return (wx.astype(matmul_dtype), whrz.astype(matmul_dtype),
            whn.astype(matmul_dtype), b)


def _vmem_estimate_bytes(tb, input_size, hidden_size, h_pad, matmul_dtype):
    w_isz = jnp.dtype(matmul_dtype).itemsize
    act = 2 * tb * (input_size + 2 * hidden_size + 1) * 4            # x,h,att,out x2 buffers
    wts = 2 * (input_size * 3 * h_pad + hidden_size * 2 * h_pad
               + h_pad * h_pad) * w_isz + 2 * 3 * h_pad * 4          # resident weights x2
    tmp = 2 * tb * (3 * h_pad + 2 * h_pad + 3 * h_pad) * 4           # f32 intermediates headroom
    return act + wts + tmp


# -----------------------------------------------------------------------------
# Wrapper
# -----------------------------------------------------------------------------
def attentional_gru(inputs, hidden, att_score, params, *,
                    block_b=1024, matmul_dtype=jnp.bfloat16,
                    vmem_budget_bytes=48 * 2 ** 20):
    """inputs: (B, I), hidden: (B, H), att_score: (B, 1) -> (B, H) float32."""
    B, I = inputs.shape
    H = hidden.shape[1]
    h_pad = _round_up(H, 128)

    inputs = inputs.astype(jnp.float32)
    hidden = hidden.astype(jnp.float32)
    att_score = att_score.astype(jnp.float32)

    # ---- batch tile selection -----------------------------------------------
    b_ceil = _round_up(B, 8)
    tb = min(_round_up(block_b, 8), b_ceil)
    # Prefer >= 2 grid steps so the "parallel" batch axis can shard across the
    # two v7x TensorCores and the pipeline has something to overlap.
    if tb >= b_ceil and b_ceil > 8:
        tb = _round_up(_cdiv(b_ceil, 2), 8)
    # Shrink the tile until the double-buffered working set fits the budget
    # (48 MiB default: safe on v7x's 64 MiB VMEM, ample on v5e/v6e's 128 MiB).
    while tb > 8 and _vmem_estimate_bytes(tb, I, H, h_pad, matmul_dtype) > vmem_budget_bytes:
        tb = _round_up(_cdiv(tb, 2), 8)
    if B < tb:                       # only when B < 8: block == full batch dim
        tb = B
    grid = (_cdiv(B, tb),)

    wx, whrz, whn, bias = pack_params(params, I, H, h_pad, matmul_dtype)

    est = _vmem_estimate_bytes(tb, I, H, h_pad, matmul_dtype)
    vmem_limit = int(min(vmem_budget_bytes, max(2 * est, 16 * 2 ** 20)))

    w_isz = jnp.dtype(matmul_dtype).itemsize
    cost = pl.CostEstimate(
        flops=2 * B * (I * 3 * h_pad + H * 2 * h_pad + h_pad * h_pad),
        transcendentals=3 * B * h_pad,
        bytes_accessed=(4 * B * (I + 2 * H + 1)
                        + w_isz * (I * 3 * h_pad + H * 2 * h_pad + h_pad * h_pad)
                        + 4 * 3 * h_pad),
    )

    kernel = functools.partial(agru_kernel, hidden_size=H, h_pad=h_pad,
                               matmul_dtype=matmul_dtype)

    return pl.pallas_call(
        kernel,
        out_shape=jax.ShapeDtypeStruct((B, H), jnp.float32),
        grid=grid,
        in_specs=[
            pl.BlockSpec((tb, I), lambda i: (i, 0)),           # x   (batch-tiled)
            pl.BlockSpec((tb, H), lambda i: (i, 0)),           # h   (batch-tiled)
            pl.BlockSpec((tb, 1), lambda i: (i, 0)),           # att (batch-tiled)
            pl.BlockSpec((I, 3 * h_pad), lambda i: (0, 0)),    # Wx_all (resident)
            pl.BlockSpec((H, 2 * h_pad), lambda i: (0, 0)),    # Wh_rz  (resident)
            pl.BlockSpec((h_pad, h_pad), lambda i: (0, 0)),    # Wh_n   (resident)
            pl.BlockSpec((1, 3 * h_pad), lambda i: (0, 0)),    # bias   (resident)
        ],
        out_specs=pl.BlockSpec((tb, H), lambda i: (i, 0)),
        compiler_params=pltpu.CompilerParams(
            dimension_semantics=("parallel",),
            vmem_limit_bytes=vmem_limit),
        cost_estimate=cost,
    )(inputs, hidden, att_score, wx, whrz, whn, bias)


# -----------------------------------------------------------------------------
# Parameter init (mirrors the PyTorch module shapes) and pure-JAX reference
# -----------------------------------------------------------------------------
def init_params(key, input_size, hidden_size):
    I, H = input_size, hidden_size
    fan_in = I + H
    fan_out = H
    xavier_std = (2.0 / (fan_in + fan_out)) ** 0.5
    bias_bound = 1.0 / (fan_in ** 0.5)

    keys = jax.random.split(key, 6)
    params = {}
    for name, (wk, bk) in zip(("r", "z", "n"),
                              [(keys[0], keys[1]), (keys[2], keys[3]), (keys[4], keys[5])]):
        w = jax.random.normal(wk, (H, I + H), dtype=jnp.float32) * xavier_std
        b = jax.random.uniform(bk, (1, H), dtype=jnp.float32,
                               minval=-bias_bound, maxval=bias_bound)
        wt = w.T                                  # (I+H, H)
        params[f"w{name}x"] = wt[:I, :]           # (I, H)
        params[f"w{name}h"] = wt[I:, :]           # (H, H)
        params[f"b{name}"] = b                    # (1, H)
    return params


def reference_forward(inputs, hidden, att_score, params):
    mm = functools.partial(jnp.dot, precision=jax.lax.Precision.HIGHEST)
    r = jax.nn.sigmoid(mm(inputs, params["wrx"]) + mm(hidden, params["wrh"]) + params["br"])
    z = jax.nn.sigmoid(mm(inputs, params["wzx"]) + mm(hidden, params["wzh"]) + params["bz"]) * att_score
    n = jnp.tanh(mm(inputs, params["wnx"]) + mm(r * hidden, params["wnh"]) + params["bn"])
    return (1.0 - z) * hidden + z * n


# -----------------------------------------------------------------------------
# Test
# -----------------------------------------------------------------------------
if __name__ == "__main__":
    key = jax.random.PRNGKey(0)
    k_x, k_h, k_a, k_p, k_x2, k_h2, k_a2 = jax.random.split(key, 7)

    I, H = 16, 32
    params = init_params(k_p, I, H)

    # --- small batch (single grid step), f32 MXU path (tight check) ----------
    B = 8
    inputs = jax.random.normal(k_x, (B, I), dtype=jnp.float32)
    hidden = jax.random.normal(k_h, (B, H), dtype=jnp.float32)
    att_score = jax.random.uniform(k_a, (B, 1), dtype=jnp.float32)

    out = jax.block_until_ready(
        attentional_gru(inputs, hidden, att_score, params, matmul_dtype=jnp.float32))
    ref = reference_forward(inputs, hidden, att_score, params)
    assert out.shape == (B, H)
    assert jnp.allclose(out, ref, atol=2e-4, rtol=2e-4), "small-batch f32 mismatch"

    # --- larger batch: multi-step "parallel" grid with a ragged last tile ----
    B2 = 300
    inputs2 = jax.random.normal(k_x2, (B2, I), dtype=jnp.float32)
    hidden2 = jax.random.normal(k_h2, (B2, H), dtype=jnp.float32)
    att2 = jax.random.uniform(k_a2, (B2, 1), dtype=jnp.float32)

    out2 = jax.block_until_ready(
        attentional_gru(inputs2, hidden2, att2, params,
                        block_b=128, matmul_dtype=jnp.float32))
    ref2 = reference_forward(inputs2, hidden2, att2, params)
    assert out2.shape == (B2, H)
    assert jnp.allclose(out2, ref2, atol=2e-4, rtol=2e-4), "tiled f32 mismatch"

    # --- default path: bf16 MXU operands, f32 accumulation / elementwise -----
    out3 = jax.block_until_ready(attentional_gru(inputs2, hidden2, att2, params))
    assert out3.shape == (B2, H)
    assert jnp.allclose(out3, ref2, atol=5e-2, rtol=5e-2), "bf16 path mismatch"

    print("KERNEL_OK")
</pallas_src>

<mosaic_0001>
module attributes {stable_mosaic.version = 11 : i64} {
  func.func @agru_kernel(%arg0: i32, %arg1: memref<8x16xf32, #tpu.memory_space<vmem>>, %arg2: memref<8x32xf32, #tpu.memory_space<vmem>>, %arg3: memref<8x1xf32, #tpu.memory_space<vmem>>, %arg4: memref<16x384xf32, #tpu.memory_space<vmem>>, %arg5: memref<32x256xf32, #tpu.memory_space<vmem>>, %arg6: memref<128x128xf32, #tpu.memory_space<vmem>>, %arg7: memref<1x384xf32, #tpu.memory_space<vmem>>, %arg8: memref<8x32xf32, #tpu.memory_space<vmem>>) attributes {dimension_semantics = [#tpu.dimension_semantics<parallel>], iteration_bounds = array<i64: 1>, scalar_prefetch = 0 : i64, scratch_operands = 0 : i64, tpu.core_type = #tpu.core_type<tc>, window_params = [{transform_indices = @transform_0, window_bounds = array<i64: 8, 16>}, {transform_indices = @transform_1, window_bounds = array<i64: 8, 32>}, {transform_indices = @transform_2, window_bounds = array<i64: 8, 1>}, {pipeline_mode = #tpu.pipeline_mode<synchronous>, transform_indices = @transform_3, window_bounds = array<i64: 16, 384>}, {pipeline_mode = #tpu.pipeline_mode<synchronous>, transform_indices = @transform_4, window_bounds = array<i64: 32, 256>}, {pipeline_mode = #tpu.pipeline_mode<synchronous>, transform_indices = @transform_5, window_bounds = array<i64: 128, 128>}, {pipeline_mode = #tpu.pipeline_mode<synchronous>, transform_indices = @transform_6, window_bounds = array<i64: 1, 384>}, {transform_indices = @transform_7, window_bounds = array<i64: 8, 32>}]} {
    %c0 = arith.constant 0 : index
    %c0_0 = arith.constant 0 : index
    %0 = vector.load %arg1[%c0, %c0_0] : memref<8x16xf32, #tpu.memory_space<vmem>>, vector<8x16xf32>
    %c0_1 = arith.constant 0 : index
    %c0_2 = arith.constant 0 : index
    %1 = vector.load %arg2[%c0_1, %c0_2] : memref<8x32xf32, #tpu.memory_space<vmem>>, vector<8x32xf32>
    %c0_3 = arith.constant 0 : index
    %c0_4 = arith.constant 0 : index
    %2 = vector.load %arg3[%c0_3, %c0_4] : memref<8x1xf32, #tpu.memory_space<vmem>>, vector<8x1xf32>
    %cst = arith.constant 0.000000e+00 : f32
    %3 = vector.broadcast %cst : f32 to vector<8x96xf32>
    %4 = tpu.concatenate %1, %3 in 1 : vector<8x32xf32>, vector<8x96xf32> -> vector<8x128xf32>
    %c0_5 = arith.constant 0 : index
    %c0_6 = arith.constant 0 : index
    %5 = vector.load %arg4[%c0_5, %c0_6] : memref<16x384xf32, #tpu.memory_space<vmem>>, vector<16x384xf32>
    %cst_7 = arith.constant dense<0.000000e+00> : vector<8x384xf32>
    %6 = tpu.matmul %0, %5, %cst_7 {dimension_numbers = #tpu.dot_dimension_numbers<[1], [0], [0], [1], [0, 0, 1, 1], [], []>} : vector<8x16xf32>, vector<16x384xf32>, vector<8x384xf32> -> vector<8x384xf32>
    %c0_8 = arith.constant 0 : index
    %c0_9 = arith.constant 0 : index
    %7 = vector.load %arg7[%c0_8, %c0_9] : memref<1x384xf32, #tpu.memory_space<vmem>>, vector<1x384xf32>
    %8 = vector.broadcast %7 : vector<1x384xf32> to vector<8x384xf32>
    %9 = arith.addf %6, %8 : vector<8x384xf32>
    %c0_10 = arith.constant 0 : index
    %c0_11 = arith.constant 0 : index
    %10 = vector.load %arg5[%c0_10, %c0_11] : memref<32x256xf32, #tpu.memory_space<vmem>>, vector<32x256xf32>
    %cst_12 = arith.constant dense<0.000000e+00> : vector<8x256xf32>
    %11 = tpu.matmul %1, %10, %cst_12 {dimension_numbers = #tpu.dot_dimension_numbers<[1], [0], [0], [1], [0, 0, 1, 1], [], []>} : vector<8x32xf32>, vector<32x256xf32>, vector<8x256xf32> -> vector<8x256xf32>
    %12 = vector.extract_strided_slice %9 {offsets = [0, 0], sizes = [8, 256], strides = [1, 1]} : vector<8x384xf32> to vector<8x256xf32>
    %13 = arith.addf %12, %11 : vector<8x256xf32>
    %14 = arith.negf %13 : vector<8x256xf32>
    %15 = math.exp %14 : vector<8x256xf32>
    %cst_13 = arith.constant 1.000000e+00 : f32
    %16 = vector.broadcast %cst_13 : f32 to vector<8x256xf32>
    %17 = arith.addf %16, %15 : vector<8x256xf32>
    %18 = arith.divf %16, %17 : vector<8x256xf32>
    %19 = vector.extract_strided_slice %18 {offsets = [0, 0], sizes = [8, 128], strides = [1, 1]} : vector<8x256xf32> to vector<8x128xf32>
    %20 = vector.extract_strided_slice %18 {offsets = [0, 128], sizes = [8, 128], strides = [1, 1]} : vector<8x256xf32> to vector<8x128xf32>
    %21 = vector.shape_cast %2 : vector<8x1xf32> to vector<8x1xf32>
    %22 = vector.broadcast %21 : vector<8x1xf32> to vector<8x128xf32>
    %23 = arith.mulf %20, %22 : vector<8x128xf32>
    %24 = arith.mulf %19, %4 : vector<8x128xf32>
    %25 = vector.extract_strided_slice %9 {offsets = [0, 256], sizes = [8, 128], strides = [1, 1]} : vector<8x384xf32> to vector<8x128xf32>
    %c0_14 = arith.constant 0 : index
    %c0_15 = arith.constant 0 : index
    %26 = vector.load %arg6[%c0_14, %c0_15] : memref<128x128xf32, #tpu.memory_space<vmem>>, vector<128x128xf32>
    %cst_16 = arith.constant dense<0.000000e+00> : vector<8x128xf32>
    %27 = tpu.matmul %24, %26, %cst_16 {dimension_numbers = #tpu.dot_dimension_numbers<[1], [0], [0], [1], [0, 0, 1, 1], [], []>} : vector<8x128xf32>, vector<128x128xf32>, vector<8x128xf32> -> vector<8x128xf32>
    %28 = arith.addf %25, %27 : vector<8x128xf32>
    %29 = math.tanh %28 : vector<8x128xf32>
    %30 = arith.subf %29, %4 : vector<8x128xf32>
    %31 = arith.mulf %23, %30 : vector<8x128xf32>
    %32 = arith.addf %4, %31 : vector<8x128xf32>
    %33 = vector.extract_strided_slice %32 {offsets = [0, 0], sizes = [8, 32], strides = [1, 1]} : vector<8x128xf32> to vector<8x32xf32>
    %c0_17 = arith.constant 0 : index
    %c0_18 = arith.constant 0 : index
    %34 = vector.load %arg8[%c0_17, %c0_18] : memref<8x32xf32, #tpu.memory_space<vmem>>, vector<8x32xf32>
    tpu.vector_store %arg8[%c0_17, %c0_18], %33 {strides = array<i32>} : memref<8x32xf32, #tpu.memory_space<vmem>>, vector<8x32xf32>,
    return
  }
  func.func @transform_0(%arg0: i32) -> (i32, i32) {
    %c0_i32 = arith.constant 0 : i32
    %c0_i32_0 = arith.constant 0 : i32
    return %arg0, %c0_i32 : i32, i32
  }
  func.func @transform_1(%arg0: i32) -> (i32, i32) {
    %c0_i32 = arith.constant 0 : i32
    %c0_i32_0 = arith.constant 0 : i32
    return %arg0, %c0_i32 : i32, i32
  }
  func.func @transform_2(%arg0: i32) -> (i32, i32) {
    %c0_i32 = arith.constant 0 : i32
    %c0_i32_0 = arith.constant 0 : i32
    return %arg0, %c0_i32 : i32, i32
  }
  func.func @transform_3(%arg0: i32) -> (i32, i32) {
    %c0_i32 = arith.constant 0 : i32
    %c0_i32_0 = arith.constant 0 : i32
    %c0_i32_1 = arith.constant 0 : i32
    return %c0_i32, %c0_i32_0 : i32, i32
  }
  func.func @transform_4(%arg0: i32) -> (i32, i32) {
    %c0_i32 = arith.constant 0 : i32
    %c0_i32_0 = arith.constant 0 : i32
    %c0_i32_1 = arith.constant 0 : i32
    return %c0_i32, %c0_i32_0 : i32, i32
  }
  func.func @transform_5(%arg0: i32) -> (i32, i32) {
    %c0_i32 = arith.constant 0 : i32
    %c0_i32_0 = arith.constant 0 : i32
    %c0_i32_1 = arith.constant 0 : i32
    return %c0_i32, %c0_i32_0 : i32, i32
  }
  func.func @transform_6(%arg0: i32) -> (i32, i32) {
    %c0_i32 = arith.constant 0 : i32
    %c0_i32_0 = arith.constant 0 : i32
    %c0_i32_1 = arith.constant 0 : i32
    return %c0_i32, %c0_i32_0 : i32, i32
  }
  func.func @transform_7(%arg0: i32) -> (i32, i32) {
    %c0_i32 = arith.constant 0 : i32
    %c0_i32_0 = arith.constant 0 : i32
    return %arg0, %c0_i32 : i32, i32
  }
}

</mosaic_0001>

<bundles_post_ra>
// kernel: tpu_custom_call.1
= control target key start
LH: loop header
LB: loop body
LE: loop exit
PB: predicated region body
PF: predicated region fallthrough
CT: control target
= control target key end

     0   :  { %12 = vsyncpa [#allocation3], 0  ;;  %s776_s0 = inlined_call_operand.vmem [shape: f32[8,16], index: 0, kind: input, shape index: {}]   ;;  %s777_s1 = inlined_call_operand.hbm [shape: f32[8,32], index: 1, kind: input, shape index: {}]   ;;  %s778_s2 = inlined_call_operand.vmem [shape: f32[8,1], index: 2, kind: input, shape index: {}]   ;;  %s779_s3 = inlined_call_operand.hbm [shape: f32[16,384], index: 3, kind: input, shape index: {}]   ;;  %s780_s4 = inlined_call_operand.hbm [shape: f32[32,256], index: 4, kind: input, shape index: {}]   ;;  %s781_s5 = inlined_call_operand.hbm [shape: f32[128,128], index: 5, kind: input, shape index: {}]   ;;  %s782_s6 = inlined_call_operand.vmem [shape: f32[1,384], index: 6, kind: input, shape index: {}]   ;;  %s783_s7 = inlined_call_operand.hbm [shape: f32[8,32], index: 7, kind: output, shape index: {}]  }
   0x1   :  { %13 = vsyncpa [#allocation6], 0 }
   0x2   :  { %14 = vsyncpa [#allocation9], 0 }
   0x3   :  { %15 = vsyncpa [#allocation4], 0  ;;  %s665_s24 = smov [#allocation5]  }
   0x4   :  { %s35_s25 = sshll.u32 %s665_s24, 4  ;;  %s36_s25 = int_to_ptr.vmem [resolvable:$true] %s35_s25 }
   0x5   :  { %s565_s26 = scalar_lea.vmem %s36_s25, 768  ;;  %p570_p1 = scmp.lt.s32.totalorder %s36_s25, %s36_s25 }
   0x6   :  { %p566_p0 = scmp.ne.s32.totalorder %s36_s25, %s565_s26  ;;  %p571_p2 = scmp.lt.s32.totalorder %s565_s26, %s565_s26 }
   0x8   :  { %p572_p3 = por %p571_p2, %p570_p1 }
   0xa   :  { %p573_p4 = pnand %p572_p3, %p566_p0 }
   0xc   :  { %576 = shalt.err (!%p573_p4)
}
   0xd   :  { %s666_s27 = smov 384   ;;  %s667_s28 = smov 24  }
   0xe   :  { %41 = dma.hbm_to_vmem [thread:$0]  %s779_s3, 768, %s36_s25, [#allocation6], %s666_s27, %s666_s27, %s667_s28  }
   0xf   :  { %s668_s8 = smov [#allocation2]   ;;  %s669_s10 = smov [#allocation7]  }
  0x10   :  { %s24_s9 = sshll.u32 %s668_s8, 4  ;;  %s47_s11 = sshll.u32 %s669_s10, 4  ;;  %s25_s9 = int_to_ptr.vmem [resolvable:$true] %s24_s9  ;;  %s48_s11 = int_to_ptr.vmem [resolvable:$true] %s47_s11 }
  0x11   :  { %s585_s12 = scalar_lea.vmem %s25_s9, 128  ;;  %p590_p6 = scmp.lt.s32.totalorder %s25_s9, %s25_s9 }
  0x12   :  { %p586_p5 = scmp.ne.s32.totalorder %s25_s9, %s585_s12  ;;  %p591_p7 = scmp.lt.s32.totalorder %s585_s12, %s585_s12 }
  0x14   :  { %p592_p8 = por %p591_p7, %p590_p6 }
  0x16   :  { %p593_p9 = pnand %p592_p8, %p586_p5 }
  0x18   :  { %596 = shalt.err (!%p593_p9)
}
  0x19   :  { %27 = dma.hbm_to_vmem [thread:$0]  %s777_s1, 128, %s25_s9, [#allocation3]  }
  0x1a   :  { %s605_s15 = scalar_lea.vmem %s48_s11, 1024  ;;  %p610_p11 = scmp.lt.s32.totalorder %s48_s11, %s48_s11 }
  0x1b   :  { %p606_p10 = scmp.ne.s32.totalorder %s48_s11, %s605_s15  ;;  %p611_p12 = scmp.lt.s32.totalorder %s605_s15, %s605_s15 }
  0x1d   :  { %p612_p13 = por %p611_p12, %p610_p11 }
  0x1f   :  { %p613_p0 = pnand %p612_p13, %p606_p10 }
  0x21   :  { %616 = shalt.err (!%p613_p0)
}
  0x22   :  { %s670_s3 = smov 256   ;;  %s671_s16 = smov 16  }
  0x23   :  { %53 = dma.hbm_to_vmem [thread:$0]  %s780_s4, 1024, %s48_s11, [#allocation6], %s670_s3, %s670_s3, %s671_s16  }
  0x24   :  { %s672_s19 = smov [#allocation8]  }
  0x25   :  { %s59_s20 = sshll.u32 %s672_s19, 4  ;;  %s60_s20 = int_to_ptr.vmem [resolvable:$true] %s59_s20 }
  0x26   :  { %s625_s21 = scalar_lea.vmem %s60_s20, 2048  ;;  %p630_p2 = scmp.lt.s32.totalorder %s60_s20, %s60_s20 }
  0x27   :  { %p626_p1 = scmp.ne.s32.totalorder %s60_s20, %s625_s21  ;;  %p631_p3 = scmp.lt.s32.totalorder %s625_s21, %s625_s21 }
  0x29   :  { %p632_p4 = por %p631_p3, %p630_p2 }
  0x2b   :  { %p633_p5 = pnand %p632_p4, %p626_p1 }
  0x2d   :  { %636 = shalt.err (!%p633_p5)
}
  0x2e   :  { %s673_s1 = smov 128   ;;  %s674_s22 = smov 8  }
  0x2f   :  { %65 = dma.hbm_to_vmem [thread:$0]  %s781_s5, 2048, %s60_s20, [#allocation9], %s673_s1, %s673_s1, %s674_s22  }
  0x30   :  { %657 = dma.done.wait [#allocation3], 128  }
  0x31   :  { %658 = vsyncadd [#allocation3], 4294967168 }
  0x32   :  { %659 = dma.done.wait [#allocation6], 1792  }
  0x33   :  { %660 = vsyncadd [#allocation6], 4294965504 }
  0x34   :  { %661 = dma.done.wait [#allocation9], 2048  }
  0x35   :  { %662 = vsyncadd [#allocation9], 4294965248  ;;  %v675_v0 = vmov 0.0   ;;  %v676_v1 = vmov 0   ;;  %vm677_vm0 = vmmov 0   ;;  %v89_v2 = vld [vmem:[#allocation5 + $0x20] sm:$0xff]  ;;  %v93_v35 = vlaneseq }
  0x36   :  { %176 = vmatprep.mubr.f32.mxu0 %v675_v0  ;;  %497 = vmatprep.subr.mxu1 %v675_v0  ;;  %v88_v3 = vld [vmem:[#allocation5 + $0x18] sm:$0xff]  ;;  %v86_v4 = vld [vmem:[#allocation5 + $0x8] sm:$0xff]  ;;  %v85_v5 = vld [vmem:[#allocation5] sm:$0xff]  ;;  %vm108_vm1 = vcmask 130048   ;;  %vm83_vm2 = vcmask 261120  }
  0x37   :  { %546 = vset.pattern.permute.xlu0 %v676_v1  ;;  %529 = vmatprep.mubr.msk.f32.mxu1 %vm677_vm0, %v675_v0  ;;  %v80_v6 = vld [vmem:[%s776_s0] sm:$0xff]  ;;  %v90_v7 = vld [vmem:[#allocation5 + $0x28] sm:$0xff]  ;;  %v87_v8 = vld [vmem:[#allocation5 + $0x10] sm:$0xff]  ;;  %v94_v36 = vshrl.u32 %v93_v35, 7 }
  0x38   :  { %140 = vmatprep.subr.mxu0 %v89_v2  ;;  %v82_v9 = vld [vmem:[%s778_s2] sm:$0xff]  ;;  %v260_v10 = vld [vmem:[#allocation7 + $0x38] sm:$0xff]  ;;  %v259_v11 = vld [vmem:[#allocation7 + $0x30] sm:$0xff] }
  0x39   :  { %141 = vmatpush1.msra.mxu0 %v88_v3  ;;  %351 = vperm.xlu0 %546, %v82_v9   ;;  %v258_v12 = vld [vmem:[#allocation7 + $0x28] sm:$0xff]  ;;  %v257_v13 = vld [vmem:[#allocation7 + $0x20] sm:$0xff]  ;;  %v256_v14 = vld [vmem:[#allocation7 + $0x18] sm:$0xff]  ;;  %v95_v39 = vsub.s32 0, %v94_v36  ;;  %v99_v53 = vsub.s32 1, %v94_v36  ;;  %v103_v59 = vsub.s32 2, %v94_v36 }
  0x3a   :  { %142 = vmatprep.subr.mxu0 %v86_v4  ;;  %v255_v15 = vld [vmem:[#allocation7 + $0x10] sm:$0xff]  ;;  %v254_v16 = vld [vmem:[#allocation7 + $0x8] sm:$0xff]  ;;  %v253_v17 = vld [vmem:[#allocation7] sm:$0xff] }
  0x3b   :  { %143 = vmatpush1.msra.mxu0 %v85_v5  ;;  %v748_v18 = vld [vmem:[#allocation2] sm:$0xff]  ;;  %v371_v19 = vld [vmem:[#allocation8 + $0x78] sm:$0xff]  ;;  %v370_v20 = vld [vmem:[#allocation8 + $0x70] sm:$0xff] }
  0x3c   :  { %465 = vmatmul.mubr.msk.f32.vlgmr.msra.gmra.mxu0 %vm108_vm1, %v80_v6  ;;  %490 = vmatprep.subr.mxu0 %v675_v0  ;;  %v369_v21 = vld [vmem:[#allocation8 + $0x68] sm:$0xff]  ;;  %v368_v22 = vld [vmem:[#allocation8 + $0x60] sm:$0xff]  ;;  %v367_v23 = vld [vmem:[#allocation8 + $0x58] sm:$0xff]  ;;  %v84_v50 = vsel %vm83_vm2, %v748_v18, 0.0 }
  0x3d   :  { %491 = vmatpush3.msra.mxu0 %v90_v7  ;;  %494 = vmatprep.mubr.msk.f32.mxu0 %vm677_vm0, %v675_v0  ;;  %v366_v24 = vld [vmem:[#allocation8 + $0x50] sm:$0xff]  ;;  %v365_v25 = vld [vmem:[#allocation8 + $0x48] sm:$0xff]  ;;  %v364_v26 = vld [vmem:[#allocation8 + $0x40] sm:$0xff] }
  0x3e   :  { %492 = vmatprep.subr.mxu0 %v675_v0  ;;  %498 = vmatpush3.msra.mxu1 %v371_v19  ;;  %v363_v27 = vld [vmem:[#allocation8 + $0x38] sm:$0xff]  ;;  %v362_v28 = vld [vmem:[#allocation8 + $0x30] sm:$0xff]  ;;  %v361_v29 = vld [vmem:[#allocation8 + $0x28] sm:$0xff] }
  0x3f   :  { %493 = vmatpush3.msra.mxu0 %v87_v8  ;;  %499 = vmatprep.subr.mxu1 %v675_v0  ;;  %v360_v30 = vld [vmem:[#allocation8 + $0x20] sm:$0xff]  ;;  %v359_v31 = vld [vmem:[#allocation8 + $0x18] sm:$0xff]  ;;  %v358_v32 = vld [vmem:[#allocation8 + $0x10] sm:$0xff] }
  0x40   :  { %495 = vmatmul.mubr.msk.f32.vlgmr.msra.gmra.mxu0 %vm108_vm1, %v80_v6  ;;  %288 = vmatprep.subr.mxu0 %v260_v10  ;;  %v357_v33 = vld [vmem:[#allocation8 + $0x8] sm:$0xff]  ;;  %v356_v34 = vld [vmem:[#allocation8] sm:$0xff] }
  0x41   :  { %289 = vmatpush1.msra.mxu0 %v259_v11  ;;  %328 = vmatprep.mubr.f32.mxu0 %v675_v0  ;;  %v91_v40 = vld [vmem:[%s782_s6] sm:$0x7]  ;;  %s678_s6 = smov [#allocation10]  }
  0x42   :  { %290 = vmatprep.subr.mxu0 %v258_v12  ;;  %500 = vmatpush3.msra.mxu1 %v370_v20  ;;  %v96_v43 = vrot.slane %v91_v40, %v95_v39  ;;  %v100_v54 = vrot.slane %v91_v40, %v99_v53  ;;  %v104_v61 = vrot.slane %v91_v40, %v103_v59  ;;  %s454_s27 = sshll.u32 %s678_s6, 4  ;;  %s455_s27 = int_to_ptr.vmem [resolvable:$true] %s454_s27 }
  0x43   :  { %291 = vmatpush1.msra.mxu0 %v257_v13  ;;  %501 = vmatprep.subr.mxu1 %v675_v0  ;;  %s637_s28 = scalar_lea.vmem %s455_s27, 128  ;;  %p642_p7 = scmp.lt.s32.totalorder %s455_s27, %s455_s27 }
  0x44   :  { %292 = vmatprep.subr.mxu0 %v256_v14  ;;  %502 = vmatpush3.msra.mxu1 %v369_v21  ;;  %p638_p6 = scmp.ne.s32.totalorder %s455_s27, %s637_s28  ;;  %p643_p8 = scmp.lt.s32.totalorder %s637_s28, %s637_s28 }
  0x45   :  { %293 = vmatpush1.msra.mxu0 %v255_v15  ;;  %503 = vmatprep.subr.mxu1 %v675_v0 }
  0x46   :  { %294 = vmatprep.subr.mxu0 %v254_v16  ;;  %504 = vmatpush3.msra.mxu1 %v368_v22  ;;  %p644_p9 = por %p643_p8, %p642_p7 }
  0x47   :  { %295 = vmatpush1.msra.mxu0 %v253_v17  ;;  %505 = vmatprep.subr.mxu1 %v675_v0 }
  0x48   :  { %467 = vmatmul.mubr.msk.f32.vlgmr.msra.gmra.mxu0 %vm83_vm2, %v748_v18  ;;  %506 = vmatpush3.msra.mxu1 %v367_v23  ;;  %p645_p10 = pnand %p644_p9, %p638_p6 }
  0x49   :  { %507 = vmatprep.subr.mxu1 %v675_v0 }
  0x4a   :  { %508 = vmatpush3.msra.mxu1 %v366_v24 }
  0x4b   :  { %509 = vmatprep.subr.mxu1 %v675_v0 }
  0x4c   :  { %510 = vmatpush3.msra.mxu1 %v365_v25 }
  0x4d   :  { %511 = vmatprep.subr.mxu1 %v675_v0 }
  0x4e   :  { %512 = vmatpush3.msra.mxu1 %v364_v26 }
  0x4f   :  { %513 = vmatprep.subr.mxu1 %v675_v0 }
  0x50   :  { %514 = vmatpush3.msra.mxu1 %v363_v27 }
  0x51   :  { %515 = vmatprep.subr.mxu1 %v675_v0 }
  0x52   :  { %516 = vmatpush3.msra.mxu1 %v362_v28 }
  0x53   :  { %517 = vmatprep.subr.mxu1 %v675_v0 }
  0x54   :  { %518 = vmatpush3.msra.mxu1 %v361_v29 }
  0x55   :  { %519 = vmatprep.subr.mxu1 %v675_v0 }
  0x56   :  { %520 = vmatpush3.msra.mxu1 %v360_v30 }
  0x57   :  { %521 = vmatprep.subr.mxu1 %v675_v0 }
  0x58   :  { %522 = vmatpush3.msra.mxu1 %v359_v31 }
  0x59   :  { %523 = vmatprep.subr.mxu1 %v675_v0 }
  0x5a   :  { %524 = vmatpush3.msra.mxu1 %v358_v32 }
  0x5b   :  { %525 = vmatprep.subr.mxu1 %v675_v0 }
  0x5c   :  { %526 = vmatpush3.msra.mxu1 %v357_v33 }
  0x5d   :  { %527 = vmatprep.subr.mxu1 %v675_v0 }
  0x5e   :  { %528 = vmatpush3.msra.mxu1 %v356_v34 }
  0xb4   :  { %v352_v4 = vpop.permute.xlu0 %351 }
  0xfc   :  { %v178_v37 = vpop.f32.mrf.mxu0 }
  0xfd   :  { %v179_v44 = vadd.f32 %v178_v37, %v96_v43 }
  0xfe   :  { %v180_v38 = vpop.f32.mrf.mxu0 }
  0xff   :  { %v181_v56 = vadd.f32 %v180_v38, %v100_v54 }
 0x100   :  { %v249_v41 = vpop.f32.mrf.mxu0 }
 0x101   :  { %v250_v63 = vadd.f32 %v249_v41, %v104_v61 }
 0x102   :  { %v496_v42 = vpop.f32.mrf.mxu0 }
 0x108   :  { %v330_v45 = vpop.f32.mrf.mxu0 }
 0x109   :  { %v335_v46 = vadd.f32 %v330_v45, %v179_v44 }
 0x10a   :  { %v332_v55 = vpop.f32.mrf.mxu0 }
 0x10b   :  { %v468_v47 = vmul.f32 -1.442695, %v335_v46  ;;  %v336_v57 = vadd.f32 %v332_v55, %v181_v56 }
 0x10d   :  { %547 = vpow2.f32 %v468_v47  ;;  %v469_v58 = vmul.f32 -1.442695, %v336_v57 }
 0x11a   :  { %v548_v48 = vpop.eup %547 }
 0x11b   :  { %v343_v49 = vadd.f32 1.0, %v548_v48 }
 0x11d   :  { %549 = vrcp.f32 %v343_v49 }
 0x11e   :  { %551 = vpow2.f32 %v469_v58 }
 0x12a   :  { %v550_v51 = vpop.eup %549 }
 0x12b   :  { %v355_v52 = vmul.f32 %v550_v51, %v84_v50  ;;  %v552_v60 = vpop.eup %551 }
 0x12c   :  { %v344_v62 = vadd.f32 1.0, %v552_v60 }
 0x12d   :  { %530 = vmatmul.mubr.f32.vlgmr.msra.gmra.mxu1 %v355_v52 }
 0x12e   :  { %553 = vrcp.f32 %v344_v62 }
 0x13b   :  { %v554_v3 = vpop.eup %553 }
 0x13c   :  { %v354_v6 = vmul.f32 %v554_v3, %v352_v4 }
 0x1ed   :  { %v438_v0 = vpop.f32.mrf.mxu1 }
 0x1ee   :  { %v442_v1 = vadd.f32 %v438_v0, %v250_v63 }
 0x1ef   :  { %v531_v2 = vpop.f32.mrf.mxu1 }
 0x1f0   :  { %555 = vtanh.f32 %v442_v1 }
 0x1fd   :  { %v556_v5 = vpop.eup %555 }
 0x1fe   :  { %v444_v7 = vsub.f32 %v556_v5, %v84_v50 }
 0x200   :  { %v445_v8 = vmul.f32 %v444_v7, %v354_v6 }
 0x202   :  { %v446_v9 = vadd.f32 %v445_v8, %v84_v50 }
 0x204   :  { %447 = vst.msk [vmem:[#allocation10] sm:$0xff] %vm83_vm2, %v446_v9 }
 0x205   :  { %648 = shalt.err (!%p645_p10)
}
 0x206   :  { %457 = dma.vmem_to_hbm [thread:$0]  %s455_s27, 128, %s783_s7, [#allocation4]  }
 0x207   :  { %663 = dma.done.wait [#allocation4], 128  }
 0x208   :  { %664 = vsyncadd [#allocation4], 4294967168 }
 0x209   :  { %461 = vsyncpa [#allocation3], 1 }
 0x20a   :  { %462 = vsyncpa [#allocation6], 1 }
 0x20b   :  { %463 = vsyncpa [#allocation9], 1 }
 0x20c   :  { %464 = vsyncpa [#allocation4], 1 }

</bundles_post_ra>
